<compile_context>
chip_gen: v6e
topology: v6e:2x2x1
jax: 0.10.0
libtpu: 0.0.40
codegen_flags: <defaults>
</compile_context>

<pallas_src>
import jax
import jax.numpy as jnp
from jax.experimental import pallas as pl
from jax.experimental.pallas import tpu as pltpu


def _round_up(x, m):
    return (x + m - 1) // m * m


def gated_equivariant_kernel(s_ref, vt_ref, Wt_ref, W1t_ref, b1_ref,
                             W2t_ref, b2_ref, s_out_ref, v_out_ref):
    # s_ref:  (Bt, D)  f32        vt_ref: (3, Bt, D) f32
    # Wt:     (D, D)   bf16       W1t:    (2D, 2D)   bf16   b1: (1, 2D) f32
    # W2t:    (2D, 2D) bf16       b2:     (1, 2D)    f32
    Bt, D = s_ref.shape

    # --- vector path: one fused MXU matmul over all three components --------
    # Wv[c,b,i] = sum_j v[c,b,j] * W[i,j]  ==  (vt_flat @ W.T)[cb, i]
    vt_flat = vt_ref[...].reshape(3 * Bt, D).astype(jnp.bfloat16)
    wv_flat = jnp.dot(vt_flat, Wt_ref[...],
                      preferred_element_type=jnp.float32)      # (3*Bt, D) f32
    wv = wv_flat.reshape(3, Bt, D)

    wv_norm = jnp.sqrt(jnp.sum(wv * wv, axis=0))                # (Bt, D) f32

    # --- scalar path: merged K=N=2D matmuls (full MXU fill on v6e/v7x) ------
    s = s_ref[...]                                              # (Bt, D) f32
    hcat = jnp.concatenate([s, wv_norm], axis=-1).astype(jnp.bfloat16)
    h = jnp.dot(hcat, W1t_ref[...],
                preferred_element_type=jnp.float32) + b1_ref[...]   # (Bt, 2D)
    h = h * jax.nn.sigmoid(h)                                   # SiLU, f32
    out = jnp.dot(h.astype(jnp.bfloat16), W2t_ref[...],
                  preferred_element_type=jnp.float32) + b2_ref[...]  # (Bt, 2D)

    s_delta = out[:, :D]                                        # lane-aligned
    v_had = out[:, D:]

    # --- residuals (read vt from the ref only in the epilogue) --------------
    s_out_ref[...] = s + s_delta
    v_out_ref[...] = vt_ref[...] + wv * v_had[None, :, :]


def gated_equivariant_block_cm(s, v_cm, params, *, block_b=512):
    """Channel-major entry point (preferred): s (B, D), v_cm (3, B, D)."""
    W, W1, b1, W2, b2 = params
    B, D = s.shape
    D2 = 2 * D

    # Pre-transpose / pre-cast weights once in the wrapper (bf16 MXU operands).
    Wt = W.T.astype(jnp.bfloat16)            # (D, D):  x @ Wt == x @ W.T
    W1t = W1.T.astype(jnp.bfloat16)          # (2D, 2D)
    W2t = W2.T.astype(jnp.bfloat16)          # (2D, 2D)
    b1r = b1.reshape(1, D2).astype(jnp.float32)
    b2r = b2.reshape(1, D2).astype(jnp.float32)

    # >= 2 grid steps (v7x megacore sharding); padding bounded (< 8 rows/step).
    n_steps = max(2, pl.cdiv(B, block_b))
    Bt = _round_up(pl.cdiv(B, n_steps), 8)
    Bp = n_steps * Bt
    if Bp != B:
        s = jnp.pad(s, ((0, Bp - B), (0, 0)))
        v_cm = jnp.pad(v_cm, ((0, 0), (0, Bp - B), (0, 0)))

    const2 = lambda i: (0, 0)

    s_out, vt_out = pl.pallas_call(
        gated_equivariant_kernel,
        grid=(n_steps,),
        in_specs=[
            pl.BlockSpec((Bt, D), lambda i: (i, 0)),        # s
            pl.BlockSpec((3, Bt, D), lambda i: (0, i, 0)),  # v (channel-major)
            pl.BlockSpec((D, D), const2),                   # Wt   (resident)
            pl.BlockSpec((D2, D2), const2),                 # W1t  (resident)
            pl.BlockSpec((1, D2), const2),                  # b1
            pl.BlockSpec((D2, D2), const2),                 # W2t  (resident)
            pl.BlockSpec((1, D2), const2),                  # b2
        ],
        out_specs=(
            pl.BlockSpec((Bt, D), lambda i: (i, 0)),
            pl.BlockSpec((3, Bt, D), lambda i: (0, i, 0)),
        ),
        out_shape=(jax.ShapeDtypeStruct((Bp, D), jnp.float32),
                   jax.ShapeDtypeStruct((3, Bp, D), jnp.float32)),
        compiler_params=pltpu.CompilerParams(
            dimension_semantics=("parallel",),
            vmem_limit_bytes=32 * 1024 * 1024),
    )(s, v_cm, Wt, W1t, b1r, W2t, b2r)

    if Bp != B:
        s_out = s_out[:B]
        vt_out = vt_out[:, :B]
    return s_out, vt_out


def gated_equivariant_block(s, v, params, *, block_b=512):
    """PyTorch-layout compatibility wrapper: s (B, D), v (B, D, 3).

    The (B,D,3) <-> (3,B,D) transposes are separate HBM-bound XLA passes;
    production callers should use gated_equivariant_block_cm directly.
    """
    v_cm = jnp.transpose(v, (2, 0, 1))                       # (3, B, D)
    s_out, v_cm_out = gated_equivariant_block_cm(s, v_cm, params,
                                                 block_b=block_b)
    return s_out, jnp.transpose(v_cm_out, (1, 2, 0))         # back to (B, D, 3)


def reference(s, v, params):
    W, W1, b1, W2, b2 = params
    D = s.shape[1]
    Wv = jnp.einsum('ij,bjc->bic', W, v)
    Wv_norm = jnp.sqrt(jnp.sum(Wv * Wv, axis=2))
    si = jnp.concatenate([s, Wv_norm], axis=1)
    h = si @ W1.T + b1
    h = h * jax.nn.sigmoid(h)
    out = h @ W2.T + b2
    s_delta, v_had = out[:, :D], out[:, D:]
    return s + s_delta, v + Wv * v_had[:, :, None]


if __name__ == "__main__":
    D = 128   # state_dim=128 as in the module default

    key = jax.random.PRNGKey(0)
    k_w, k_w1, k_b1, k_w2, k_b2, k_s, k_v, k_s2, k_v2 = jax.random.split(key, 9)

    # Deterministic parameter init (shapes match nn.Module.__init__):
    #   W  ~ xavier_normal: std = sqrt(2 / (fan_in + fan_out))
    #   Linear(2D, 2D): weight (2D, 2D), bias (2D,) ~ U(-1/sqrt(in), 1/sqrt(in))
    W = jax.random.normal(k_w, (D, D), jnp.float32) * (2.0 / (D + D)) ** 0.5
    bound = 1.0 / (2 * D) ** 0.5
    W1 = jax.random.uniform(k_w1, (2 * D, 2 * D), jnp.float32, -bound, bound)
    b1 = jax.random.uniform(k_b1, (2 * D,), jnp.float32, -bound, bound)
    W2 = jax.random.uniform(k_w2, (2 * D, 2 * D), jnp.float32, -bound, bound)
    b2 = jax.random.uniform(k_b2, (2 * D,), jnp.float32, -bound, bound)
    params = (W, W1, b1, W2, b2)

    # bf16 MXU operands with f32 accumulation -> relax tolerance vs f32 ref.
    TOL = dict(atol=5e-2, rtol=5e-2)

    # Case 1: small batch, default block size (2 grid steps of 8 rows).
    B = 16
    s = jax.random.normal(k_s, (B, D), jnp.float32)
    v = jax.random.normal(k_v, (B, D, 3), jnp.float32)
    s_out, v_out = gated_equivariant_block(s, v, params)
    jax.block_until_ready((s_out, v_out))
    s_ref, v_ref = reference(s, v, params)
    assert jnp.allclose(s_out, s_ref, **TOL)
    assert jnp.allclose(v_out, v_ref, **TOL)

    # Case 2: ragged batch with multi-step grid + padding + output slicing.
    B2 = 37
    s2 = jax.random.normal(k_s2, (B2, D), jnp.float32)
    v2 = jax.random.normal(k_v2, (B2, D, 3), jnp.float32)
    s_out2, v_out2 = gated_equivariant_block(s2, v2, params, block_b=16)
    jax.block_until_ready((s_out2, v_out2))
    s_ref2, v_ref2 = reference(s2, v2, params)
    assert jnp.allclose(s_out2, s_ref2, **TOL)
    assert jnp.allclose(v_out2, v_ref2, **TOL)

    print("KERNEL_OK")
</pallas_src>

<mosaic_0001>
module attributes {stable_mosaic.version = 11 : i64} {
  func.func @gated_equivariant_kernel(%arg0: i32, %arg1: memref<8x128xf32, #tpu.memory_space<vmem>>, %arg2: memref<3x8x128xf32, #tpu.memory_space<vmem>>, %arg3: memref<128x128xbf16, #tpu.memory_space<vmem>>, %arg4: memref<256x256xbf16, #tpu.memory_space<vmem>>, %arg5: memref<1x256xf32, #tpu.memory_space<vmem>>, %arg6: memref<256x256xbf16, #tpu.memory_space<vmem>>, %arg7: memref<1x256xf32, #tpu.memory_space<vmem>>, %arg8: memref<8x128xf32, #tpu.memory_space<vmem>>, %arg9: memref<3x8x128xf32, #tpu.memory_space<vmem>>) attributes {dimension_semantics = [#tpu.dimension_semantics<parallel>], iteration_bounds = array<i64: 2>, scalar_prefetch = 0 : i64, scratch_operands = 0 : i64, tpu.core_type = #tpu.core_type<tc>, window_params = [{transform_indices = @transform_0, window_bounds = array<i64: 8, 128>}, {transform_indices = @transform_1, window_bounds = array<i64: 3, 8, 128>}, {pipeline_mode = #tpu.pipeline_mode<synchronous>, transform_indices = @transform_2, window_bounds = array<i64: 128, 128>}, {pipeline_mode = #tpu.pipeline_mode<synchronous>, transform_indices = @transform_3, window_bounds = array<i64: 256, 256>}, {pipeline_mode = #tpu.pipeline_mode<synchronous>, transform_indices = @transform_4, window_bounds = array<i64: 1, 256>}, {pipeline_mode = #tpu.pipeline_mode<synchronous>, transform_indices = @transform_5, window_bounds = array<i64: 256, 256>}, {pipeline_mode = #tpu.pipeline_mode<synchronous>, transform_indices = @transform_6, window_bounds = array<i64: 1, 256>}, {transform_indices = @transform_7, window_bounds = array<i64: 8, 128>}, {transform_indices = @transform_8, window_bounds = array<i64: 3, 8, 128>}]} {
    %c0 = arith.constant 0 : index
    %c0_0 = arith.constant 0 : index
    %c0_1 = arith.constant 0 : index
    %0 = vector.load %arg2[%c0, %c0_0, %c0_1] : memref<3x8x128xf32, #tpu.memory_space<vmem>>, vector<3x8x128xf32>
    %1 = vector.shape_cast %0 : vector<3x8x128xf32> to vector<24x128xf32>
    %2 = arith.truncf %1 : vector<24x128xf32> to vector<24x128xbf16>
    %c0_2 = arith.constant 0 : index
    %c0_3 = arith.constant 0 : index
    %3 = vector.load %arg3[%c0_2, %c0_3] : memref<128x128xbf16, #tpu.memory_space<vmem>>, vector<128x128xbf16>
    %cst = arith.constant dense<0.000000e+00> : vector<24x128xf32>
    %4 = tpu.matmul %2, %3, %cst {dimension_numbers = #tpu.dot_dimension_numbers<[1], [0], [0], [1], [0, 0, 1, 1], [], []>} : vector<24x128xbf16>, vector<128x128xbf16>, vector<24x128xf32> -> vector<24x128xf32>
    %5 = vector.shape_cast %4 : vector<24x128xf32> to vector<3x8x128xf32>
    %6 = arith.mulf %5, %5 : vector<3x8x128xf32>
    %cst_4 = arith.constant dense<0.000000e+00> : vector<8x128xf32>
    %7 = vector.multi_reduction <add>, %6, %cst_4 [0] : vector<3x8x128xf32> to vector<8x128xf32>
    %8 = math.sqrt %7 : vector<8x128xf32>
    %c0_5 = arith.constant 0 : index
    %c0_6 = arith.constant 0 : index
    %9 = vector.load %arg1[%c0_5, %c0_6] : memref<8x128xf32, #tpu.memory_space<vmem>>, vector<8x128xf32>
    %10 = tpu.concatenate %9, %8 in 1 : vector<8x128xf32>, vector<8x128xf32> -> vector<8x256xf32>
    %11 = arith.truncf %10 : vector<8x256xf32> to vector<8x256xbf16>
    %c0_7 = arith.constant 0 : index
    %c0_8 = arith.constant 0 : index
    %12 = vector.load %arg4[%c0_7, %c0_8] : memref<256x256xbf16, #tpu.memory_space<vmem>>, vector<256x256xbf16>
    %cst_9 = arith.constant dense<0.000000e+00> : vector<8x256xf32>
    %13 = tpu.matmul %11, %12, %cst_9 {dimension_numbers = #tpu.dot_dimension_numbers<[1], [0], [0], [1], [0, 0, 1, 1], [], []>} : vector<8x256xbf16>, vector<256x256xbf16>, vector<8x256xf32> -> vector<8x256xf32>
    %c0_10 = arith.constant 0 : index
    %c0_11 = arith.constant 0 : index
    %14 = vector.load %arg5[%c0_10, %c0_11] : memref<1x256xf32, #tpu.memory_space<vmem>>, vector<1x256xf32>
    %15 = vector.broadcast %14 : vector<1x256xf32> to vector<8x256xf32>
    %16 = arith.addf %13, %15 : vector<8x256xf32>
    %17 = arith.negf %16 : vector<8x256xf32>
    %18 = math.exp %17 : vector<8x256xf32>
    %cst_12 = arith.constant 1.000000e+00 : f32
    %19 = vector.broadcast %cst_12 : f32 to vector<8x256xf32>
    %20 = arith.addf %19, %18 : vector<8x256xf32>
    %21 = arith.divf %19, %20 : vector<8x256xf32>
    %22 = arith.mulf %16, %21 : vector<8x256xf32>
    %23 = arith.truncf %22 : vector<8x256xf32> to vector<8x256xbf16>
    %c0_13 = arith.constant 0 : index
    %c0_14 = arith.constant 0 : index
    %24 = vector.load %arg6[%c0_13, %c0_14] : memref<256x256xbf16, #tpu.memory_space<vmem>>, vector<256x256xbf16>
    %cst_15 = arith.constant dense<0.000000e+00> : vector<8x256xf32>
    %25 = tpu.matmul %23, %24, %cst_15 {dimension_numbers = #tpu.dot_dimension_numbers<[1], [0], [0], [1], [0, 0, 1, 1], [], []>} : vector<8x256xbf16>, vector<256x256xbf16>, vector<8x256xf32> -> vector<8x256xf32>
    %c0_16 = arith.constant 0 : index
    %c0_17 = arith.constant 0 : index
    %26 = vector.load %arg7[%c0_16, %c0_17] : memref<1x256xf32, #tpu.memory_space<vmem>>, vector<1x256xf32>
    %27 = vector.broadcast %26 : vector<1x256xf32> to vector<8x256xf32>
    %28 = arith.addf %25, %27 : vector<8x256xf32>
    %29 = vector.extract_strided_slice %28 {offsets = [0, 0], sizes = [8, 128], strides = [1, 1]} : vector<8x256xf32> to vector<8x128xf32>
    %30 = vector.extract_strided_slice %28 {offsets = [0, 128], sizes = [8, 128], strides = [1, 1]} : vector<8x256xf32> to vector<8x128xf32>
    %31 = arith.addf %9, %29 : vector<8x128xf32>
    %c0_18 = arith.constant 0 : index
    %c0_19 = arith.constant 0 : index
    %32 = vector.load %arg8[%c0_18, %c0_19] : memref<8x128xf32, #tpu.memory_space<vmem>>, vector<8x128xf32>
    tpu.vector_store %arg8[%c0_18, %c0_19], %31 {strides = array<i32>} : memref<8x128xf32, #tpu.memory_space<vmem>>, vector<8x128xf32>,
    %c0_20 = arith.constant 0 : index
    %c0_21 = arith.constant 0 : index
    %c0_22 = arith.constant 0 : index
    %33 = vector.load %arg2[%c0_20, %c0_21, %c0_22] : memref<3x8x128xf32, #tpu.memory_space<vmem>>, vector<3x8x128xf32>
    %34 = vector.shape_cast %30 : vector<8x128xf32> to vector<1x8x128xf32>
    %35 = vector.broadcast %34 : vector<1x8x128xf32> to vector<3x8x128xf32>
    %36 = arith.mulf %5, %35 : vector<3x8x128xf32>
    %37 = arith.addf %33, %36 : vector<3x8x128xf32>
    %c0_23 = arith.constant 0 : index
    %c0_24 = arith.constant 0 : index
    %c0_25 = arith.constant 0 : index
    %38 = vector.load %arg9[%c0_23, %c0_24, %c0_25] : memref<3x8x128xf32, #tpu.memory_space<vmem>>, vector<3x8x128xf32>
    tpu.vector_store %arg9[%c0_23, %c0_24, %c0_25], %37 {strides = array<i32>} : memref<3x8x128xf32, #tpu.memory_space<vmem>>, vector<3x8x128xf32>,
    return
  }
  func.func @transform_0(%arg0: i32) -> (i32, i32) {
    %c0_i32 = arith.constant 0 : i32
    %c0_i32_0 = arith.constant 0 : i32
    return %arg0, %c0_i32 : i32, i32
  }
  func.func @transform_1(%arg0: i32) -> (i32, i32, i32) {
    %c0_i32 = arith.constant 0 : i32
    %c0_i32_0 = arith.constant 0 : i32
    %c0_i32_1 = arith.constant 0 : i32
    return %c0_i32, %arg0, %c0_i32_0 : i32, i32, i32
  }
  func.func @transform_2(%arg0: i32) -> (i32, i32) {
    %c0_i32 = arith.constant 0 : i32
    %c0_i32_0 = arith.constant 0 : i32
    %c0_i32_1 = arith.constant 0 : i32
    return %c0_i32, %c0_i32_0 : i32, i32
  }
  func.func @transform_3(%arg0: i32) -> (i32, i32) {
    %c0_i32 = arith.constant 0 : i32
    %c0_i32_0 = arith.constant 0 : i32
    %c0_i32_1 = arith.constant 0 : i32
    return %c0_i32, %c0_i32_0 : i32, i32
  }
  func.func @transform_4(%arg0: i32) -> (i32, i32) {
    %c0_i32 = arith.constant 0 : i32
    %c0_i32_0 = arith.constant 0 : i32
    %c0_i32_1 = arith.constant 0 : i32
    return %c0_i32, %c0_i32_0 : i32, i32
  }
  func.func @transform_5(%arg0: i32) -> (i32, i32) {
    %c0_i32 = arith.constant 0 : i32
    %c0_i32_0 = arith.constant 0 : i32
    %c0_i32_1 = arith.constant 0 : i32
    return %c0_i32, %c0_i32_0 : i32, i32
  }
  func.func @transform_6(%arg0: i32) -> (i32, i32) {
    %c0_i32 = arith.constant 0 : i32
    %c0_i32_0 = arith.constant 0 : i32
    %c0_i32_1 = arith.constant 0 : i32
    return %c0_i32, %c0_i32_0 : i32, i32
  }
  func.func @transform_7(%arg0: i32) -> (i32, i32) {
    %c0_i32 = arith.constant 0 : i32
    %c0_i32_0 = arith.constant 0 : i32
    return %arg0, %c0_i32 : i32, i32
  }
  func.func @transform_8(%arg0: i32) -> (i32, i32, i32) {
    %c0_i32 = arith.constant 0 : i32
    %c0_i32_0 = arith.constant 0 : i32
    %c0_i32_1 = arith.constant 0 : i32
    return %c0_i32, %arg0, %c0_i32_0 : i32, i32, i32
  }
}

</mosaic_0001>

<bundles_post_ra>
// kernel: tpu_custom_call.1
= control target key start
LH: loop header
LB: loop body
LE: loop exit
PB: predicated region body
PF: predicated region fallthrough
CT: control target
= control target key end

     0   :  { %s2237_s0 = inlined_call_operand.hbm [shape: f32[16,128], index: 0, kind: input, shape index: {}]   ;;  %s2238_s1 = inlined_call_operand.hbm [shape: f32[3,16,128], index: 1, kind: input, shape index: {}]   ;;  %s2239_s2 = inlined_call_operand.hbm [shape: bf16[128,128], index: 2, kind: input, shape index: {}]   ;;  %s2240_s3 = inlined_call_operand.hbm [shape: bf16[256,256], index: 3, kind: input, shape index: {}]   ;;  %s2241_s4 = inlined_call_operand.vmem [shape: f32[1,256], index: 4, kind: input, shape index: {}]   ;;  %s2242_s5 = inlined_call_operand.hbm [shape: bf16[256,256], index: 5, kind: input, shape index: {}]   ;;  %s2243_s6 = inlined_call_operand.vmem [shape: f32[1,256], index: 6, kind: input, shape index: {}]   ;;  %s2244_s7 = inlined_call_operand.hbm [shape: f32[16,128], index: 7, kind: output, shape index: {0}]   ;;  %s2245_s8 = inlined_call_operand.hbm [shape: f32[3,16,128], index: 8, kind: output, shape index: {1}]  }
   0x1   :  { %2251 = sst [smem:[#allocation21_spill]] %s2237_s0 }
   0x2   :  { %2252 = sst [smem:[#allocation22_spill]] %s2239_s2 }
   0x3   :  { %2253 = sst [smem:[#allocation23_spill]] %s2240_s3 }
   0x4   :  { %2254 = sst [smem:[#allocation24_spill]] %s2242_s5 }
   0x5   :  { %14 = vsyncpa [#allocation3], 0 }
   0x6   :  { %16 = vsyncpa [#allocation3 + $0x1], 0 }
   0x7   :  { %17 = vsyncpa [#allocation6], 0 }
   0x8   :  { %19 = vsyncpa [#allocation6 + $0x1], 0 }
   0x9   :  { %20 = vsyncpa [#allocation9], 0 }
   0xa   :  { %21 = vsyncpa [#allocation4], 0 }
   0xb   :  { %23 = vsyncpa [#allocation4 + $0x1], 0 }
   0xc   :  { %24 = vsyncpa [#allocation13], 0 }
   0xd   :  { %26 = vsyncpa [#allocation13 + $0x1], 0  ;;  %s1891_s27 = smov 0   ;;  %s1893_s28 = smov 0  }
   0xe   :  { %s1895_s29 = smov 0   ;;  %s1897_s30 = smov 0  }
   0xf LB: > { %s1912_s9 = sadd.s32 4294967295, %s1829_s30   ;;  %s1254_s10 = sadd.s32 4294967294, %s1829_s30   ;;  %s1829_s30 = sphi %s1897_s30, %s2282_s30   ;;  %s1825_s29 = sphi %s1895_s29, %s2281_s29   ;;  %s1821_s28 = sphi %s1893_s28, %s2280_s28   ;;  %s1817_s27 = sphi %s1891_s27, %s2279_s27  }
  0x10   : > { %p52_p0 = scmp.ne.s32.totalorder %s1821_s28, %s1817_s27  ;;  %p2246_p1 = scmp.eq.s32.totalorder %s1912_s9, 0 }
  0x11   : > { %p213_p3 = scmp.eq.s32.totalorder %s1254_s10, 1  ;;  %p1255_p5 = scmp.ge.s32.totalorder %s1829_s30, 1 }
  0x12   : > { %p1921_p4 = por %p2246_p1, %p52_p0  ;;  %p246_p7 = scmp.lt.s32.totalorder %s1829_s30, 3 }
  0x13   : > { %p1926_p6 = por %p213_p3, %p52_p0  ;;  %s1831_s14 = smov [#allocation7]  }
  0x14   : > { %s2255_s11 = scalar_select %p1921_p4, 1, 0 }
  0x15   : > { %s2256_s12 = scalar_select %p1926_p6, 1, 0 }
  0x16   : > { %p1931_p8 = pnand %p1255_p5, %p246_p7  ;;  %s258_s15 = sshll.u32 %s1831_s14, 4  ;;  %s259_s15 = int_to_ptr.vmem [resolvable:$true] %s258_s15 }
  0x17   : > { %s1832_s17 = smov [#allocation8]   ;;  %s1600_s19 = scalar_lea.vmem %s259_s15, 1024 }
  0x18   : > { %p1400_p9 = pneg %p1931_p8  ;;  %s271_s18 = sshll.u32 %s1832_s17, 4  ;;  %s272_s18 = int_to_ptr.vmem [resolvable:$true] %s271_s18 }
  0x19   : > { %p1601_p13 = scmp.ne.s32.totalorder %s259_s15, %s1600_s19  ;;  %p1608_p5 = scmp.lt.s32.totalorder %s259_s15, %s259_s15 }
  0x1a   : > { %p1940_p11 = pnand %p1400_p9, %p2246_p1  ;;  %p1609_p7 = scmp.lt.s32.totalorder %s1600_s19, %s1600_s19 }
  0x1c   : > { %p1591_p12 = pneg %p1940_p11  ;;  %p1610_p10 = por %p1609_p7, %p1608_p5 }
  0x1e   : > { %p1603_p0 = pnand %p1601_p13, %p1591_p12 }
  0x20   : > { %p1604_p3 = pneg %p1603_p0 }
  0x22   : > { %p1611_p9 = pnand %p1610_p10, %p1604_p3 }
  0x24   : > { %1614 = shalt.err (!%p1611_p9)
}
  0x25   : > { %s1833_s20 = smov 64   ;;  %s1834_s21 = smov 4  }
  0x26   : > { %s2259_s2 = sld [smem:[#allocation22_spill]]  ;;  %s1626_s24 = scalar_lea.vmem %s272_s18, 4096 }
  0x27   : > { %p1627_p1 = scmp.ne.s32.totalorder %s272_s18, %s1626_s24  ;;  %p1634_p2 = scmp.lt.s32.totalorder %s272_s18, %s272_s18 }
  0x28   : > { %p1635_p6 = scmp.lt.s32.totalorder %s1626_s24, %s1626_s24 }
  0x29   : > { %p1629_p13 = pnand %p1627_p1, %p1591_p12 }
  0x2a   : > { %p1636_p5 = por %p1635_p6, %p1634_p2 }
  0x2b   : > { %p1630_p0 = pneg %p1629_p13 }
  0x2c   : > { %1403 = dma.hbm_to_vmem [thread:$0]  (!%p1940_p11), %s2259_s2, 1024, %s259_s15, [#allocation6], %s1833_s20, %s1833_s20, %s1834_s21  }
  0x2d   : > { %p1637_p10 = pnand %p1636_p5, %p1630_p0 }
  0x2f   : > { %1640 = shalt.err (!%p1637_p10)
}
  0x30   : > { %s2247_s25 = smov 128   ;;  %s2248_s26 = smov 8  }
  0x31   : > { %s2260_s3 = sld [smem:[#allocation23_spill]]  ;;  %s1837_s15 = smov [#allocation10]  }
  0x32   : > { %s287_s17 = sshll.u32 %s1837_s15, 4  ;;  %s1966_s19 = sadd.s32 1, %s1829_s30   ;;  %s288_s17 = int_to_ptr.vmem [resolvable:$true] %s287_s17 }
  0x33   : > { %s1652_s20 = scalar_lea.vmem %s288_s17, 4096  ;;  %p1660_p3 = scmp.lt.s32.totalorder %s288_s17, %s288_s17 }
  0x34   : > { %p1653_p1 = scmp.ne.s32.totalorder %s288_s17, %s1652_s20  ;;  %p1661_p7 = scmp.lt.s32.totalorder %s1652_s20, %s1652_s20 }
  0x36   : > { %p1655_p2 = pnand %p1653_p1, %p1591_p12  ;;  %p1662_p9 = por %p1661_p7, %p1660_p3 }
  0x37   : > { %1406 = dma.hbm_to_vmem [thread:$0]  (!%p1940_p11), %s2260_s3, 4096, %s272_s18, [#allocation9], %s2247_s25, %s2247_s25, %s2248_s26  }
  0x38   : > { %p1656_p6 = pneg %p1655_p2 }
  0x3a   : > { %p1663_p13 = pnand %p1662_p9, %p1656_p6 }
  0x3c   : > { %1666 = shalt.err (!%p1663_p13)
}
  0x3d   : > { %s2261_s5 = sld [smem:[#allocation24_spill]]  ;;  %s36_s22 = ssub.s32 %s1829_s30, %s1966_s19 }
  0x3e   : > { %s39_s16 = sadd.s32 1, %s1825_s29  ;;  %p37_p12 = scmp.eq.s32.totalorder %s36_s22, 0 }
  0x3f   : > { %p46_p0 = scmp.ne.s32.totalorder %s1825_s29, %s1821_s28  ;;  %p47_p5 = scmp.eq.s32.totalorder %s1829_s30, 0 }
  0x40   : > { %p1427_p10 = scmp.lt.s32.totalorder %s1829_s30, 2  ;;  %p2263_p2 = scmp.eq.s32.totalorder %s1912_s9, 1 }
  0x41   : > { %s1987_s23 = scalar_select %p37_p12, %s1825_s29, %s39_s16  }
  0x42   : > { %p48_p1 = por %p47_p5, %p46_p0  ;;  %p1991_p6 = por %p2263_p2, %p46_p0 }
  0x43   : > { %1409 = dma.hbm_to_vmem [thread:$0]  (!%p1940_p11), %s2261_s5, 4096, %s288_s17, [#allocation9], %s2247_s25, %s2247_s25, %s2248_s26  }
  0x44   : > { %2262 = sst [smem:[#allocation20_spill]] %s1987_s23  ;;  %s1996_s10 = sand.u32 1, %s1825_s29  }
  0x45   : > { %s2264_s24 = scalar_select %p1991_p6, 1, 0 }
  0x46   : > { %s1261_s14 = sshll.u32 %s1829_s30, 7  ;;  %s1260_s15 = sshll.u32 %s1996_s10, 3 }
  0x47   : > { %s2265_s0 = sld [smem:[#allocation21_spill]]  ;;  %s308_s21 = scalar_lea.vmem [#allocation2], %s1260_s15 }
  0x48   : > { %s315_s22 = sshll.u32 %s308_s21, 4  ;;  %p2005_p11 = pnand %p1427_p10, %p48_p1  ;;  %s2009_s22 = int_to_ptr.vmem [resolvable:$true] %s315_s22 }
  0x49   : > { %s2015_s17 = scalar_lea.hbm %s2238_s1, %s1261_s14  ;;  %s305_s20 = scalar_lea.sflag [#allocation3], %s1996_s10 }
  0x4a   : > { %p1669_p7 = pneg %p2005_p11 }
  0x4d   : > { %s2003_s18 = scalar_lea.hbm %s2265_s0, %s1261_s14  ;;  %s1672_s5 = scalar_lea.hbm %s2265_s0, 256 }
  0x4e   : > { %s1667_s3 = scalar_lea.hbm %s2003_s18, 128  ;;  %p1673_p12 = scmp.lt.s32.totalorder %s2003_s18, %s2265_s0 }
  0x4f   : > { %p1668_p3 = scmp.ne.s32.totalorder %s2003_s18, %s1667_s3  ;;  %p1674_p0 = scmp.lt.s32.totalorder %s1672_s5, %s1667_s3 }
  0x51   : > { %p1670_p9 = pnand %p1669_p7, %p1668_p3  ;;  %p1675_p5 = por %p1674_p0, %p1673_p12 }
  0x53   : > { %p1671_p13 = pneg %p1670_p9 }
  0x55   : > { %p1676_p10 = pnand %p1675_p5, %p1671_p13 }
  0x57   : > { %1679 = shalt.err (!%p1676_p10)
}
  0x58   : > { %s1680_s2 = scalar_lea.vmem %s2009_s22, 128  ;;  %s1838_s26 = smov [#allocation2]  }
  0x59   : > { %p1681_p1 = scmp.ne.s32.totalorder %s2009_s22, %s1680_s2  ;;  %s1685_s14 = sshll.u32 %s1838_s26, 4  ;;  %s1686_s14 = int_to_ptr.vmem [resolvable:$false] %s1685_s14 }
  0x5a   : > { %s1687_s15 = scalar_lea.vmem %s1686_s14, 256  ;;  %p1688_p9 = scmp.lt.s32.totalorder %s2009_s22, %s1686_s14 }
  0x5b   : > { %p1683_p2 = pnand %p1681_p1, %p1669_p7  ;;  %p1689_p6 = scmp.lt.s32.totalorder %s1687_s15, %s1680_s2 }
  0x5d   : > { %p1684_p3 = pneg %p1683_p2  ;;  %p1690_p4 = por %p1689_p6, %p1688_p9 }
  0x5f   : > { %p1691_p12 = pnand %p1690_p4, %p1684_p3 }
  0x61   : > { %1694 = shalt.err (!%p1691_p12)
}
  0x62   : > { %1413 = dma.hbm_to_vmem [thread:$0]  (!%p2005_p11), %s2003_s18, 128, %s2009_s22, %s305_s20  }
  0x63   : > { %s322_s3 = sand.u32 1, %s1829_s30   ;;  %s2267_s5 = smul.u32 24, %s1996_s10 }
  0x64   : > { %s2047_s21 = scalar_lea.sflag [#allocation6], %s322_s3  ;;  %s1695_s2 = scalar_lea.hbm %s2015_s17, 384 }
  0x65   : > { %s326_s25 = scalar_lea.vmem [#allocation5], %s2267_s5  ;;  %p1696_p4 = scmp.ne.s32.totalorder %s2015_s17, %s1695_s2 }
  0x66   : > { %s332_s23 = sshll.u32 %s326_s25, 4  ;;  %s1700_s15 = scalar_lea.hbm %s2238_s1, 768  ;;  %s2045_s23 = int_to_ptr.vmem [resolvable:$true] %s332_s23 }
  0x67   : > { %p1698_p6 = pnand %p1696_p4, %p1669_p7  ;;  %p1701_p0 = scmp.lt.s32.totalorder %s2015_s17, %s2238_s1 }
  0x68   : > { %p1702_p5 = scmp.lt.s32.totalorder %s1700_s15, %s1695_s2 }
  0x69   : > { %p1699_p13 = pneg %p1698_p6 }
  0x6a   : > { %p1703_p10 = por %p1702_p5, %p1701_p0 }
  0x6c   : > { %p1704_p1 = pnand %p1703_p10, %p1699_p13 }
  0x6e   : > { %1707 = shalt.err (!%p1704_p1)
}
  0x6f   : > { %s1708_s10 = scalar_lea.vmem %s2045_s23, 384  ;;  %s1839_s22 = smov [#allocation5]  }
  0x70   : > { %p1709_p2 = scmp.ne.s32.totalorder %s2045_s23, %s1708_s10  ;;  %s1713_s20 = sshll.u32 %s1839_s22, 4  ;;  %s1714_s20 = int_to_ptr.vmem [resolvable:$false] %s1713_s20 }
  0x71   : > { %s1715_s3 = scalar_lea.vmem %s1714_s20, 768  ;;  %p1716_p12 = scmp.lt.s32.totalorder %s2045_s23, %s1714_s20 }
  0x72   : > { %p1711_p3 = pnand %p1709_p2, %p1669_p7  ;;  %p1717_p4 = scmp.lt.s32.totalorder %s1715_s3, %s1708_s10 }
  0x74   : > { %p1712_p9 = pneg %p1711_p3  ;;  %p1718_p6 = por %p1717_p4, %p1716_p12 }
  0x76   : > { %p1719_p0 = pnand %p1718_p6, %p1712_p9 }
  0x78   : > { %1722 = shalt.err (!%p1719_p0)
}
  0x79   : > { %s1840_s0 = smov 256   ;;  %s2268_s5 = smov 8  }
  0x7a   : > { %s2269_s25 = smov 128   ;;  %344 = sbr.rel (%p1931_p8) target bundleno = 866 (0x362), region = 48 }
  0x7b   : > { %1416 = dma.hbm_to_vmem [thread:$0]  (!%p2005_p11), %s2015_s17, 384, %s2045_s23, %s2047_s21, %s1840_s0, %s2269_s25, %s2268_s5  }
  0x7c   : > { %s2077_s2 = sand.u32 (!%p1931_p8), 1, %s1821_s28   ;;  %p2270_p7 = scmp.ne.s32.totalorder (!%p1931_p8), %s2255_s11, 0 }
  0x7d   : > { %s1264_s26 = sshll.u32 (!%p1931_p8), %s2077_s2, 3  ;;  %s347_s14 = scalar_lea.sflag (!%p1931_p8), [#allocation3], %s2077_s2 }
  0x7e   : > { %s2083_s16 = scalar_lea.vmem (!%p1931_p8), [#allocation2], %s1264_s26 }
  0x7f   : > { %1792 = dma.done.wait (%p2270_p7), %s347_s14, 128  }
  0x80   : > { %1794 = vsyncadd (%p2270_p7), %s347_s14, 4294967168  ;;  %s355_s13 = sand.u32 1, %s1912_s9   ;;  %s1379_s17 = smul.u32 24, %s2077_s2 }
  0x81   : > { %s356_s23 = scalar_lea.sflag [#allocation6], %s355_s13 }
  0x82   : > { %s2093_s21 = scalar_lea.vmem [#allocation5], %s1379_s17 }
  0x83   : > { %1796 = dma.done.wait (%p2270_p7), %s356_s23, 384  }
  0x84   : > { %1798 = vsyncadd (%p2270_p7), %s356_s23, 4294966912  ;;  %p2271_p8 = scmp.eq.s32.totalorder %s1912_s9, 0 }
  0x86   : > { %1800 = dma.done.wait (%p2271_p8), [#allocation6], 1024   ;;  %p2272_p11 = pmov %p2271_p8 }
  0x87   : > { %p2273_p13 = pmov %p2271_p8 }
  0x88   : > { %1802 = vsyncadd (%p2272_p11), [#allocation6], 4294966272 }
  0x89   : > { %1804 = dma.done.wait (%p2273_p13), [#allocation9], 8192   ;;  %p2274_p5 = pmov %p2271_p8 }
  0x8a   : > { %v1475_v0 = vld [vmem:[#allocation7 + $0x38] sm:$0xff]   ;;  %v1476_v1 = vld [vmem:[#allocation7 + $0x30] sm:$0xff]   ;;  %v1477_v2 = vld [vmem:[#allocation7 + $0x28] sm:$0xff]   ;;  %s1344_s22 = sshll.u32 %s1912_s9, 7  ;;  %s406_s20 = scalar_lea.vmem [#allocation11], %s1264_s26 }
  0x8b   : > { %1806 = vsyncadd (%p2274_p5), [#allocation9], 4294959104  ;;  %1358 = vmatprep.subr.bf16.mxu0 %v1475_v0  ;;  %v1478_v3 = vld [vmem:[#allocation7 + $0x20] sm:$0xff]   ;;  %v2108_v4 = vld [vmem:[%s2093_s21] sm:$0xff]  ;;  %s1086_s3 = sshll.u32 %s406_s20, 4  ;;  %s2148_s0 = scalar_lea.vmem [#allocation12], %s1379_s17  ;;  %s2157_s3 = int_to_ptr.vmem [resolvable:$true] %s1086_s3 }
  0x8c   : > { %1359 = vmatpush3.bf16.msra.mxu0 %v1475_v0  ;;  %v2111_v5 = vld [vmem:[%s2093_s21 + $0x8] sm:$0xff]  ;;  %v1486_v9 = vld [vmem:[#allocation8 + $0x64] ss:$8 sps:$4 sm:$0xff]   ;;  %v1488_v11 = vld [vmem:[#allocation8 + $0x60] ss:$8 sps:$4 sm:$0xff]   ;;  %s1098_s5 = sshll.u32 %s2148_s0, 4  ;;  %s2164_s13 = scalar_lea.hbm %s2245_s8, %s1344_s22  ;;  %s2159_s5 = int_to_ptr.vmem [resolvable:$true] %s1098_s5 }
  0x8d   : > { %1360 = vmatprep.subr.bf16.mxu0 %v1476_v1  ;;  %v418_v6 = vpack.c.bf16 %v2111_v5, %v2108_v4  ;;  %v1483_v7 = vld [vmem:[#allocation8 + $0x74] ss:$8 sps:$4 sm:$0xff]   ;;  %v1485_v8 = vld [vmem:[#allocation8 + $0x70] ss:$8 sps:$4 sm:$0xff]   ;;  %v1492_v15 = vld [vmem:[#allocation8 + $0x44] ss:$8 sps:$4 sm:$0xff]  }
  0x8e   : > { %v1479_v10 = vld [vmem:[#allocation7 + $0x18] sm:$0xff]   ;;  %751 = vmatprep.subr.bf16.mxu1 %v1483_v7  ;;  %v1480_v13 = vld [vmem:[#allocation7 + $0x10] sm:$0xff]   ;;  %v1481_v16 = vld [vmem:[#allocation7 + $0x8] sm:$0xff]   ;;  %s1068_s17 = scalar_lea.sflag [#allocation4], %s2077_s2  ;;  %s1723_s23 = scalar_lea.vmem %s2157_s3, 128 }
  0x8f   : > { %1374 = vmatprep.mubr.bf16.mxu0 %v418_v6  ;;  %752 = vmatpush1.bf16.msra.mxu1 %v1485_v8  ;;  %v1489_v12 = vld [vmem:[#allocation8 + $0x54] ss:$8 sps:$4 sm:$0xff]   ;;  %v1491_v14 = vld [vmem:[#allocation8 + $0x50] ss:$8 sps:$4 sm:$0xff]   ;;  %v1494_v17 = vld [vmem:[#allocation8 + $0x40] ss:$8 sps:$4 sm:$0xff]   ;;  %p1724_p10 = scmp.ne.s32.totalorder %s2157_s3, %s1723_s23 }
  0x90   : > { %1361 = vmatpush3.bf16.msra.mxu0 %v1476_v1  ;;  %753 = vmatprep.subr.bf16.mxu1 %v1486_v9  ;;  %v1495_v18 = vld [vmem:[#allocation8 + $0x34] ss:$8 sps:$4 sm:$0xff]   ;;  %v1482_v19 = vld [vmem:[#allocation7] sm:$0xff]   ;;  %v1497_v20 = vld [vmem:[#allocation8 + $0x30] ss:$8 sps:$4 sm:$0xff]   ;;  %p2275_p1 = scmp.ne.s32.totalorder %s2264_s24, 0 }
  0x91   : > { %1362 = vmatprep.subr.bf16.mxu0 %v1477_v2  ;;  %v1498_v21 = vld [vmem:[#allocation8 + $0x24] ss:$8 sps:$4 sm:$0xff]   ;;  %v1500_v23 = vld [vmem:[#allocation8 + $0x20] ss:$8 sps:$4 sm:$0xff]   ;;  %v1501_v24 = vld [vmem:[#allocation8 + $0x14] ss:$8 sps:$4 sm:$0xff]  }
  0x92   : > { %v2116_v22 = vld [vmem:[%s2093_s21 + $0x10] sm:$0xff]  ;;  %p1725_p2 = pnand %p1724_p10, %p2275_p1  ;;  %s1841_s21 = smov [#allocation11]  }
  0x93   : > { %754 = vmatpush1.bf16.msra.mxu1 %v1488_v11  ;;  %v419_v25 = vpack.c.bf16 %v2116_v22, %v2116_v22  ;;  %v1503_v26 = vld [vmem:[#allocation8 + $0x10] ss:$8 sps:$4 sm:$0xff]   ;;  %v1504_v27 = vld [vmem:[#allocation8 + $0x4] ss:$8 sps:$4 sm:$0xff]   ;;  %v1506_v28 = vld [vmem:[#allocation8] ss:$8 sps:$4 sm:$0xff]  }
  0x94   : > { %1363 = vmatpush3.bf16.msra.mxu0 %v1477_v2  ;;  %755 = vmatprep.subr.bf16.mxu1 %v1489_v12  ;;  %v1507_v29 = vld [vmem:[#allocation8 + $0xf4] ss:$8 sps:$4 sm:$0xff]   ;;  %v1509_v30 = vld [vmem:[#allocation8 + $0xf0] ss:$8 sps:$4 sm:$0xff]   ;;  %v1510_v31 = vld [vmem:[#allocation8 + $0xe4] ss:$8 sps:$4 sm:$0xff]   ;;  %p1726_p3 = pneg %p1725_p2 }
  0x95   : > { %1364 = vmatprep.subr.bf16.mxu0 %v1478_v3  ;;  %v1512_v32 = vld [vmem:[#allocation8 + $0xe0] ss:$8 sps:$4 sm:$0xff]   ;;  %v1513_v33 = vld [vmem:[#allocation8 + $0xd4] ss:$8 sps:$4 sm:$0xff]   ;;  %v1515_v34 = vld [vmem:[#allocation8 + $0xd0] ss:$8 sps:$4 sm:$0xff]  }
  0x96   : > { %v1516_v35 = vld [vmem:[#allocation8 + $0xc4] ss:$8 sps:$4 sm:$0xff]   ;;  %v1518_v36 = vld [vmem:[#allocation8 + $0xc0] ss:$8 sps:$4 sm:$0xff]   ;;  %v1519_v37 = vld [vmem:[#allocation8 + $0xb4] ss:$8 sps:$4 sm:$0xff]  }
  0x97   : > { %756 = vmatpush1.bf16.msra.mxu1 %v1491_v14  ;;  %v1521_v38 = vld [vmem:[#allocation8 + $0xb0] ss:$8 sps:$4 sm:$0xff]   ;;  %v1522_v39 = vld [vmem:[#allocation8 + $0xa4] ss:$8 sps:$4 sm:$0xff]   ;;  %v1524_v40 = vld [vmem:[#allocation8 + $0xa0] ss:$8 sps:$4 sm:$0xff]  }
  0x98   : > { %1365 = vmatpush3.bf16.msra.mxu0 %v1478_v3  ;;  %757 = vmatprep.subr.bf16.mxu1 %v1492_v15  ;;  %v1525_v41 = vld [vmem:[#allocation8 + $0x94] ss:$8 sps:$4 sm:$0xff]   ;;  %v1527_v42 = vld [vmem:[#allocation8 + $0x90] ss:$8 sps:$4 sm:$0xff]   ;;  %v1528_v43 = vld [vmem:[#allocation8 + $0x84] ss:$8 sps:$4 sm:$0xff]  }
  0x99   : > { %1366 = vmatprep.subr.bf16.mxu0 %v1479_v10  ;;  %v1530_v44 = vld [vmem:[#allocation8 + $0x80] ss:$8 sps:$4 sm:$0xff]   ;;  %v1531_v45 = vld [vmem:[#allocation10 + $0x70] ss:$8 sps:$4 sm:$0xff]   ;;  %v1533_v46 = vld [vmem:[#allocation10 + $0x74] ss:$8 sps:$4 sm:$0xff]  }
  0x9a   : > { %v1536_v47 = vld [vmem:[#allocation10 + $0x64] ss:$8 sps:$4 sm:$0xff]   ;;  %v1534_v48 = vld [vmem:[#allocation10 + $0x60] ss:$8 sps:$4 sm:$0xff]   ;;  %v1539_v49 = vld [vmem:[#allocation10 + $0x54] ss:$8 sps:$4 sm:$0xff]  }
  0x9b   : > { %758 = vmatpush1.bf16.msra.mxu1 %v1494_v17  ;;  %v1537_v50 = vld [vmem:[#allocation10 + $0x50] ss:$8 sps:$4 sm:$0xff]   ;;  %v1542_v51 = vld [vmem:[#allocation10 + $0x44] ss:$8 sps:$4 sm:$0xff]   ;;  %v1540_v52 = vld [vmem:[#allocation10 + $0x40] ss:$8 sps:$4 sm:$0xff]  }
  0x9c   : > { %1367 = vmatpush3.bf16.msra.mxu0 %v1479_v10  ;;  %759 = vmatprep.subr.bf16.mxu1 %v1495_v18  ;;  %v1545_v53 = vld [vmem:[#allocation10 + $0x34] ss:$8 sps:$4 sm:$0xff]   ;;  %v1543_v54 = vld [vmem:[#allocation10 + $0x30] ss:$8 sps:$4 sm:$0xff]   ;;  %v1548_v55 = vld [vmem:[#allocation10 + $0x24] ss:$8 sps:$4 sm:$0xff]  }
  0x9d   : > { %1368 = vmatprep.subr.bf16.mxu0 %v1480_v13  ;;  %v1546_v56 = vld [vmem:[#allocation10 + $0x20] ss:$8 sps:$4 sm:$0xff]   ;;  %v1551_v12 = vld [vmem:[#allocation10 + $0x14] ss:$8 sps:$4 sm:$0xff]   ;;  %v1554_v14 = vld [vmem:[#allocation10 + $0x4] ss:$8 sps:$4 sm:$0xff]  }
  0x9e   : > { %v2133_v6 = vld [vmem:[%s2083_s16] sm:$0xff]  ;;  %v1555_v17 = vld [vmem:[#allocation10 + $0xf0] ss:$8 sps:$4 sm:$0xff]   ;;  %s2155_s16 = scalar_lea.hbm %s2244_s7, %s1344_s22  ;;  %s1727_s11 = sshll.u32 %s1841_s21, 4  ;;  %s1728_s11 = int_to_ptr.vmem [resolvable:$false] %s1727_s11 }
  0x9f   : > { %760 = vmatpush1.bf16.msra.mxu1 %v1497_v20  ;;  %v545_v10 = vpack.c.bf16 %v2133_v6, %v2133_v6  ;;  %v1552_v15 = vld [vmem:[#allocation10] ss:$8 sps:$4 sm:$0xff]   ;;  %v1560_v18 = vld [vmem:[#allocation10 + $0xe4] ss:$8 sps:$4 sm:$0xff]   ;;  %v1563_v20 = vld [vmem:[#allocation10 + $0xd4] ss:$8 sps:$4 sm:$0xff]   ;;  %p1730_p9 = scmp.lt.s32.totalorder %s2157_s3, %s1728_s11 }
  0xa0   : > { %1369 = vmatpush3.bf16.msra.mxu0 %v1480_v13  ;;  %761 = vmatprep.subr.bf16.mxu1 %v1498_v21  ;;  %v1549_v13 = vld [vmem:[#allocation10 + $0x10] ss:$8 sps:$4 sm:$0xff]   ;;  %s1729_s15 = scalar_lea.vmem %s1728_s11, 256 }
  0xa1   : > { %1370 = vmatprep.subr.bf16.mxu0 %v1481_v16  ;;  %v1561_v21 = vld [vmem:[#allocation10 + $0xd0] ss:$8 sps:$4 sm:$0xff]   ;;  %p1731_p12 = scmp.lt.s32.totalorder %s1729_s15, %s1723_s23 }
  0xa3   : > { %762 = vmatpush1.bf16.msra.mxu1 %v1500_v23  ;;  %v1566_v23 = vld [vmem:[#allocation10 + $0xc4] ss:$8 sps:$4 sm:$0xff]   ;;  %p1732_p4 = por %p1731_p12, %p1730_p9 }
  0xa4   : > { %1371 = vmatpush3.bf16.msra.mxu0 %v1481_v16  ;;  %763 = vmatprep.subr.bf16.mxu1 %v1501_v24  ;;  %v1557_v16 = vld [vmem:[#allocation10 + $0xf4] ss:$8 sps:$4 sm:$0xff]   ;;  %v1564_v24 = vld [vmem:[#allocation10 + $0xc0] ss:$8 sps:$4 sm:$0xff]  }
  0xa5   : > { %1372 = vmatprep.subr.bf16.mxu0 %v1482_v19  ;;  %p1733_p6 = pnand %p1732_p4, %p1726_p3 }
  0xa7   : > { %764 = vmatpush1.bf16.msra.mxu1 %v1503_v26  ;;  %v1567_v26 = vld [vmem:[#allocation10 + $0xb0] ss:$8 sps:$4 sm:$0xff]  }
  0xa8   : > { %1373 = vmatpush3.bf16.msra.mxu0 %v1482_v19  ;;  %765 = vmatprep.subr.bf16.mxu1 %v1504_v27  ;;  %v1558_v19 = vld [vmem:[#allocation10 + $0xe0] ss:$8 sps:$4 sm:$0xff]   ;;  %v1572_v27 = vld [vmem:[#allocation10 + $0xa4] ss:$8 sps:$4 sm:$0xff]  }
  0xa9   : > { %1012 = vmatprep.subr.bf16.mxu0 %v1533_v46 }
  0xab   : > { %1375 = vmatmul.mubr.bf16.vlgmr.msra.gmra.mxu0 %v419_v25  ;;  %766 = vmatpush1.bf16.msra.mxu1 %v1506_v28  ;;  %v1569_v25 = vld [vmem:[#allocation10 + $0xb4] ss:$8 sps:$4 sm:$0xff]   ;;  %v1570_v28 = vld [vmem:[#allocation10 + $0xa0] ss:$8 sps:$4 sm:$0xff]  }
  0xac   : > { %767 = vmatprep.subr.bf16.mxu1 %v1507_v29  ;;  %1013 = vmatpush1.bf16.msra.mxu0 %v1531_v45  ;;  %v1575_v29 = vld [vmem:[#allocation10 + $0x94] ss:$8 sps:$4 sm:$0xff]  }
  0xad   : > { %1014 = vmatprep.subr.bf16.mxu0 %v1536_v47 }
  0xaf   : > { %768 = vmatpush2.bf16.msra.mxu1 %v1509_v30  ;;  %v1573_v30 = vld [vmem:[#allocation10 + $0x90] ss:$8 sps:$4 sm:$0xff]  }
  0xb0   : > { %769 = vmatprep.subr.bf16.mxu1 %v1510_v31  ;;  %1015 = vmatpush1.bf16.msra.mxu0 %v1534_v48  ;;  %v1578_v31 = vld [vmem:[#allocation10 + $0x84] ss:$8 sps:$4 sm:$0xff]  }
  0xb1   : > { %1016 = vmatprep.subr.bf16.mxu0 %v1539_v49 }
  0xb3   : > { %770 = vmatpush2.bf16.msra.mxu1 %v1512_v32  ;;  %v1576_v32 = vld [vmem:[#allocation10 + $0x80] ss:$8 sps:$4 sm:$0xff]  }
  0xb4   : > { %771 = vmatprep.subr.bf16.mxu1 %v1513_v33  ;;  %1017 = vmatpush1.bf16.msra.mxu0 %v1537_v50  ;;  %v581_v33 = vlaneseq }
  0xb5   : > { %1018 = vmatprep.subr.bf16.mxu0 %v1542_v51 }
  0xb7   : > { %772 = vmatpush2.bf16.msra.mxu1 %v1515_v34  ;;  %v582_v34 = vshrl.u32 %v581_v33, 7 }
  0xb8   : > { %773 = vmatprep.subr.bf16.mxu1 %v1516_v35  ;;  %1019 = vmatpush1.bf16.msra.mxu0 %v1540_v52 }
  0xb9   : > { %1020 = vmatprep.subr.bf16.mxu0 %v1545_v53  ;;  %v583_v35 = vsub.s32 0, %v582_v34 }
  0xbb   : > { %774 = vmatpush2.bf16.msra.mxu1 %v1518_v36  ;;  %v579_v36 = vld [vmem:[%s2241_s4] sm:$0x3] }
  0xbc   : > { %775 = vmatprep.subr.bf16.mxu1 %v1519_v37  ;;  %1021 = vmatpush1.bf16.msra.mxu0 %v1543_v54  ;;  %v587_v37 = vsub.s32 1, %v582_v34 }
  0xbd   : > { %1022 = vmatprep.subr.bf16.mxu0 %v1548_v55 }
  0xbf   : > { %776 = vmatpush2.bf16.msra.mxu1 %v1521_v38  ;;  %v584_v38 = vrot.slane %v579_v36, %v583_v35 }
  0xc0   : > { %777 = vmatprep.subr.bf16.mxu1 %v1522_v39  ;;  %1023 = vmatpush1.bf16.msra.mxu0 %v1546_v56  ;;  %v588_v39 = vrot.slane %v579_v36, %v587_v37 }
  0xc1   : > { %1024 = vmatprep.subr.bf16.mxu0 %v1551_v12 }
  0xc3   : > { %778 = vmatpush2.bf16.msra.mxu1 %v1524_v40 }
  0xc4   : > { %779 = vmatprep.subr.bf16.mxu1 %v1525_v41  ;;  %1025 = vmatpush1.bf16.msra.mxu0 %v1549_v13 }
  0xc5   : > { %1026 = vmatprep.subr.bf16.mxu0 %v1554_v14 }
  0xc7   : > { %780 = vmatpush2.bf16.msra.mxu1 %v1527_v42 }
  0xc8   : > { %781 = vmatprep.subr.bf16.mxu1 %v1528_v43  ;;  %1027 = vmatpush1.bf16.msra.mxu0 %v1552_v15 }
  0xc9   : > { %1028 = vmatprep.subr.bf16.mxu0 %v1557_v16 }
  0xcb   : > { %782 = vmatpush2.bf16.msra.mxu1 %v1530_v44 }
  0xcc   : > { %1029 = vmatpush2.bf16.msra.mxu0 %v1555_v17 }
  0xcd   : > { %1030 = vmatprep.subr.bf16.mxu0 %v1560_v18 }
  0xd0   : > { %1031 = vmatpush2.bf16.msra.mxu0 %v1558_v19 }
  0xd1   : > { %1032 = vmatprep.subr.bf16.mxu0 %v1563_v20 }
  0xd4   : > { %1033 = vmatpush2.bf16.msra.mxu0 %v1561_v21 }
  0xd5   : > { %1034 = vmatprep.subr.bf16.mxu0 %v1566_v23 }
  0xd8   : > { %1035 = vmatpush2.bf16.msra.mxu0 %v1564_v24 }
  0xd9   : > { %1036 = vmatprep.subr.bf16.mxu0 %v1569_v25 }
  0xdc   : > { %1037 = vmatpush2.bf16.msra.mxu0 %v1567_v26 }
  0xdd   : > { %1038 = vmatprep.subr.bf16.mxu0 %v1572_v27 }
  0xe0   : > { %1039 = vmatpush2.bf16.msra.mxu0 %v1570_v28 }
  0xe1   : > { %1040 = vmatprep.subr.bf16.mxu0 %v1575_v29 }
  0xe4   : > { %1041 = vmatpush2.bf16.msra.mxu0 %v1573_v30 }
  0xe5   : > { %1042 = vmatprep.subr.bf16.mxu0 %v1578_v31 }
  0xe8   : > { %1043 = vmatpush2.bf16.msra.mxu0 %v1576_v32 }
 0x16b   : > { %v2120_v57 = vpop.f32.mrf.mxu0 }
 0x16c   : > { %v534_v63 = vmul.f32 %v2120_v57, %v2120_v57 }
 0x16d   : > { %v2122_v58 = vpop.f32.mrf.mxu0 }
 0x16e   : > { %v532_v61 = vmul.f32 %v2122_v58, %v2122_v58 }
 0x16f   : > { %v1377_v59 = vpop.f32.mrf.mxu0 }
 0x171   : > { %v2124_v60 = vpop.f32.mrf.mxu0 }
 0x172   : > { %v533_v62 = vmul.f32 %v2124_v60, %v2124_v60 }
 0x174   : > { %v535_v0 = vadd.f32 %v533_v62, %v532_v61  ;;  %v840_v61 = vld [vmem:[%s2243_s6] sm:$0x3] }
 0x175   : > { %v845_v62 = vrot.slane %v840_v61, %v583_v35 }
 0x176   : > { %v536_v1 = vadd.f32 %v535_v0, %v534_v63  ;;  %v849_v63 = vrot.slane %v840_v61, %v587_v37 }
 0x178   : > { %1579 = vrsqrt.f32 %v536_v1  ;;  %vm539_vm0 = vcmp.eq.f32.partialorder %v536_v1, inf  ;;  %v542_v7 = vand.u32 2147483648, %v536_v1  ;;  %vm541_vm1 = vcmp.eq.f32.partialorder %v536_v1, 0.0 }
 0x185   : > { %v1580_v2 = vpop.eup %1579 }
 0x186   : > { %v538_v3 = vmul.f32 %v1580_v2, %v536_v1 }
 0x188   : > { %v540_v8 = vsel %vm539_vm0, %v536_v1, %v538_v3 }
 0x189   : > { %v543_v9 = vsel %vm541_vm1, %v542_v7, %v540_v8 }
 0x18a   : > { %v546_v11 = vpack.c.bf16 %v543_v9, %v543_v9 }
 0x18c   : > { %783 = vmatprep.mubr.bf16.mxu1 %v546_v11 }
 0x18d   : > { %784 = vmatmul.mubr.bf16.vlgmr.msra.gmra.mxu1 %v545_v10 }
 0x24d   : > { %v785_v40 = vpop.f32.mrf.mxu1 }
 0x24e   : > { %v786_v41 = vadd.f32 %v785_v40, %v584_v38 }
 0x24f   : > { %v787_v42 = vpop.f32.mrf.mxu1 }
 0x250   : > { %v1309_v43 = vmul.f32 -1.442695, %v786_v41  ;;  %v788_v44 = vadd.f32 %v787_v42, %v588_v39 }
 0x251   : > { %v789_v45 = vpop.f32.mrf.mxu1 }
 0x252   : > { %1581 = vpow2.f32 %v1309_v43  ;;  %v1310_v46 = vmul.f32 -1.442695, %v788_v44 }
 0x253   : > { %v790_v47 = vpop.f32.mrf.mxu1 }
 0x254   : > { %1583 = vpow2.f32 %v1310_v46 }
 0x25f   : > { %v1582_v48 = vpop.eup %1581 }
 0x260   : > { %v798_v49 = vadd.f32 1.0, %v1582_v48 }
 0x261   : > { %v1584_v50 = vpop.eup %1583 }
 0x262   : > { %1585 = vrcp.f32 %v798_v49  ;;  %v799_v51 = vadd.f32 1.0, %v1584_v50 }
 0x264   : > { %1587 = vrcp.f32 %v799_v51 }
 0x26f   : > { %v1586_v52 = vpop.eup %1585 }
 0x270   : > { %v804_v54 = vmul.f32 %v1586_v52, %v786_v41 }
 0x271   : > { %v1588_v53 = vpop.eup %1587 }
 0x272   : > { %v805_v55 = vmul.f32 %v1588_v53, %v788_v44  ;;  %v806_v59 = vpack.c.bf16 %v804_v54, %v804_v54 }
 0x274   : > { %v807_v56 = vpack.c.bf16 %v805_v55, %v805_v55 }
 0x276   : > { %1044 = vmatprep.mubr.bf16.mxu0 %v807_v56 }
 0x277   : > { %1045 = vmatmul.mubr.bf16.vlgmr.msra.gmra.mxu0 %v806_v59 }
 0x337   : > { %v1046_v0 = vpop.f32.mrf.mxu0 }
 0x338   : > { %v1047_v1 = vadd.f32 %v1046_v0, %v845_v62 }
 0x339   : > { %v1048_v2 = vpop.f32.mrf.mxu0 }
 0x33a   : > { %v1053_v3 = vadd.f32 %v1047_v1, %v2133_v6  ;;  %v1049_v7 = vadd.f32 %v1048_v2, %v849_v63 }
 0x33b   : > { %v1050_v8 = vpop.f32.mrf.mxu0 }
 0x33c   : > { %v1058_v6 = vmul.f32 %v1049_v7, %v2122_v58  ;;  %v1059_v9 = vmul.f32 %v1049_v7, %v2124_v60  ;;  %v1060_v10 = vmul.f32 %v2120_v57, %v1049_v7  ;;  %1054 = vst [vmem:[%s406_s20] sm:$0xff] %v1053_v3 }
 0x33d   : > { %v1051_v11 = vpop.f32.mrf.mxu0 }
 0x33e   : > { %1736 = shalt.err (!%p1733_p6)
}
 0x33f   : > { %s1737_s18 = scalar_lea.hbm %s2155_s16, 128  ;;  %s1741_s20 = scalar_lea.hbm %s2244_s7, 256 }
 0x340   : > { %p1738_p0 = scmp.ne.s32.totalorder %s2155_s16, %s1737_s18  ;;  %p1742_p11 = scmp.lt.s32.totalorder %s2155_s16, %s2244_s7 }
 0x341   : > { %p1743_p13 = scmp.lt.s32.totalorder %s1741_s20, %s1737_s18 }
 0x342   : > { %p1739_p7 = pnand %p1738_p0, %p2275_p1 }
 0x343   : > { %p1744_p5 = por %p1743_p13, %p1742_p11 }
 0x344   : > { %p1740_p8 = pneg %p1739_p7 }
 0x346   : > { %p1745_p10 = pnand %p1744_p5, %p1740_p8 }
 0x348   : > { %1748 = shalt.err (!%p1745_p10)
}
 0x349   : > { %1396 = dma.vmem_to_hbm [thread:$0]  (%p2275_p1), %s2157_s3, 128, %s2155_s16, %s1068_s17   ;;  %v1061_v57 = vadd.f32 %v1058_v6, %v2108_v4  ;;  %v1062_v58 = vadd.f32 %v1059_v9, %v2111_v5  ;;  %v1063_v60 = vadd.f32 %v1060_v10, %v2116_v22 }
 0x34a   : > { %s1073_s9 = scalar_lea.sflag [#allocation13], %s2077_s2  ;;  %s1749_s26 = scalar_lea.vmem %s2159_s5, 384 }
 0x34b   : > { %1064 = vst [vmem:[%s2148_s0] sm:$0xff] %v1061_v57  ;;  %1065 = vst [vmem:[%s2148_s0 + $0x8] sm:$0xff] %v1062_v58  ;;  %p1750_p2 = scmp.ne.s32.totalorder %s2159_s5, %s1749_s26  ;;  %s1842_s23 = smov [#allocation12]  }
 0x34c   : > { %1066 = vst [vmem:[%s2148_s0 + $0x10] sm:$0xff] %v1063_v60  ;;  %s1753_s21 = sshll.u32 %s1842_s23, 4  ;;  %s1754_s21 = int_to_ptr.vmem [resolvable:$false] %s1753_s21 }
 0x34d   : > { %p1751_p3 = pnand %p1750_p2, %p2275_p1  ;;  %s1755_s3 = scalar_lea.vmem %s1754_s21, 768 }
 0x34e   : > { %p1756_p12 = scmp.lt.s32.totalorder %s2159_s5, %s1754_s21  ;;  %p1757_p4 = scmp.lt.s32.totalorder %s1755_s3, %s1749_s26 }
 0x34f   : > { %p1752_p9 = pneg %p1751_p3 }
 0x350   : > { %p1758_p6 = por %p1757_p4, %p1756_p12 }
 0x352   : > { %p1759_p0 = pnand %p1758_p6, %p1752_p9 }
 0x354   : > { %1762 = shalt.err (!%p1759_p0)
}
 0x355   : > { %s1763_s0 = scalar_lea.hbm %s2164_s13, 384  ;;  %s1767_s11 = scalar_lea.hbm %s2245_s8, 768 }
 0x356   : > { %p1764_p7 = scmp.ne.s32.totalorder %s2164_s13, %s1763_s0  ;;  %p1768_p13 = scmp.lt.s32.totalorder %s2164_s13, %s2245_s8 }
 0x357   : > { %p1769_p5 = scmp.lt.s32.totalorder %s1767_s11, %s1763_s0 }
 0x358   : > { %p1765_p8 = pnand %p1764_p7, %p2275_p1 }
 0x359   : > { %p1770_p10 = por %p1769_p5, %p1768_p13 }
 0x35a   : > { %p1766_p11 = pneg %p1765_p8 }
 0x35c   : > { %p1771_p2 = pnand %p1770_p10, %p1766_p11 }
 0x35e   : > { %1774 = shalt.err (!%p1771_p2)
}
 0x35f   : > { %s1843_s10 = smov 128   ;;  %s1844_s22 = smov 256  }
 0x360   : > { %s1845_s20 = smov 8  }
 0x361   : > { %1397 = dma.vmem_to_hbm [thread:$0]  (%p2275_p1), %s2159_s5, 384, %s2164_s13, %s1073_s9, %s1843_s10, %s1844_s22, %s1845_s20  }
 0x362 PF: > { %s1113_s25 = sand.u32 1, %s1817_s27   ;;  %p2276_p3 = scmp.ne.s32.totalorder %s2256_s12, 0 }
 0x363   : > { %p2277_p9 = scmp.ge.s32.totalorder %s1829_s30, 2  ;;  %s1114_s14 = scalar_lea.sflag [#allocation4], %s1113_s25 }
 0x365   : > { %p1418_p12 = pnand %p2277_p9, %p2276_p3 }
 0x367   : > { %p1419_p4 = pneg %p1418_p12 }
 0x369   : > { %1808 = dma.done.wait (%p1419_p4), %s1114_s14, 128  }
 0x36a   : > { %1810 = vsyncadd (%p1419_p4), %s1114_s14, 4294967168  ;;  %s1123_s26 = scalar_lea.sflag [#allocation13], %s1113_s25 }
 0x36b   : > { %1812 = dma.done.wait (%p1419_p4), %s1123_s26, 384  }
 0x36c   : > { %1814 = vsyncadd (%p1419_p4), %s1123_s26, 4294966912  ;;  %s2278_s24 = sld [smem:[#allocation20_spill]]  ;;  %p29_p1 = scmp.ge.s32.totalorder %s1966_s19, 4  }
 0x36d   : > { %s2279_s27 = smov %s1821_s28  ;;  %s2280_s28 = smov %s1825_s29 }
 0x36e   : > { %s2282_s30 = smov %s1966_s19  ;;  %31 = sbr.rel (!%p29_p1) target bundleno = 15 (0xf), region = 135 }
 0x372   : > { %s2281_s29 = smov %s2278_s24 }
 0x373   :  { %1128 = vsyncpa [#allocation3], 1 }
 0x374   :  { %1130 = vsyncpa [#allocation3 + $0x1], 1 }
 0x375   :  { %1131 = vsyncpa [#allocation6], 1 }
 0x376   :  { %1133 = vsyncpa [#allocation6 + $0x1], 1 }
 0x377   :  { %1134 = vsyncpa [#allocation9], 1 }
 0x378   :  { %1135 = vsyncpa [#allocation4], 1 }
 0x379   :  { %1137 = vsyncpa [#allocation4 + $0x1], 1 }
 0x37a   :  { %1138 = vsyncpa [#allocation13], 1 }
 0x37b   :  { %1140 = vsyncpa [#allocation13 + $0x1], 1 }

</bundles_post_ra>
